<compile_context>
chip_gen: v7x
topology: tpu7x:2x2x1
jax: 0.10.0
libtpu: 0.0.40
codegen_flags: <defaults>
</compile_context>

<pallas_src>
import jax
import jax.numpy as jnp
from jax.experimental import pallas as pl
from jax.experimental.pallas import tpu as pltpu


def _round_up(x: int, m: int) -> int:
    return ((x + m - 1) // m) * m


def _cdiv(a: int, b: int) -> int:
    return (a + b - 1) // b


def _choose_tiling(B: int, block_rows: int, min_grid_steps: int):
    """Balanced batch tiling: avoids a huge padded tail and guarantees >=2 grid
    steps (v7x dual-TensorCore) when each tile would still hold >=8 real rows."""
    n_tiles = max(_cdiv(B, block_rows), 1)
    if B >= 8 * min_grid_steps:
        n_tiles = max(n_tiles, min_grid_steps)
    TM = _round_up(_cdiv(B, n_tiles), 8)
    B_P = n_tiles * TM
    return TM, B_P, n_tiles


def mlp_kernel(x_ref, w1_ref, b1_ref, w2_ref, b2_ref, out_ref):
    """Fused forward for one batch tile: sigmoid(relu(x @ W1 + b1) @ W2 + b2)."""
    # x arrives at natural width in f32; cast to bf16 on the VPU for the MXU.
    x = x_ref[...].astype(jnp.bfloat16)           # (TM, IN)
    w1 = w1_ref[...]                              # (IN, HID_P)  bf16, VMEM-resident
    w2 = w2_ref[...]                              # (HID_P, OUT) bf16, VMEM-resident

    # Layer 1: bf16 MXU matmul, f32 accumulation; bias + ReLU in f32 (v5e-safe).
    h = jnp.dot(x, w1, preferred_element_type=jnp.float32) + b1_ref[...]
    h = jnp.maximum(h, 0.0)

    # Layer 2: cast activations to bf16 for the MXU, accumulate in f32.
    logits = jnp.dot(h.astype(jnp.bfloat16), w2,
                     preferred_element_type=jnp.float32) + b2_ref[...]

    # Exact sigmoid (EUP exp + f32 divide). Memory-bound kernel -> cost invisible.
    out_ref[...] = 1.0 / (1.0 + jnp.exp(-logits))


def prepare_params(w1, b1, w2, b2):
    """One-time padding/casting of the weights (call at init, reuse every forward).

    w1: (in, hidden), b1: (1, hidden) or (hidden,), w2: (hidden, out), b2: (1, out) or (out,).
    Only the hidden axis is padded to a 128-lane multiple; padded rows/cols are zero
    so they contribute exactly nothing.
    """
    in_features, hidden = w1.shape
    out_features = w2.shape[1]
    HID_P = _round_up(hidden, 128)

    w1_p = jnp.zeros((in_features, HID_P), jnp.bfloat16)
    w1_p = w1_p.at[:, :hidden].set(w1.astype(jnp.bfloat16))
    b1_p = jnp.zeros((1, HID_P), jnp.float32)
    b1_p = b1_p.at[:, :hidden].set(jnp.reshape(b1, (1, -1)).astype(jnp.float32))
    w2_p = jnp.zeros((HID_P, out_features), jnp.bfloat16)
    w2_p = w2_p.at[:hidden, :].set(w2.astype(jnp.bfloat16))
    b2_p = jnp.reshape(b2, (1, -1)).astype(jnp.float32)
    return w1_p, b1_p, w2_p, b2_p


def fraud_detection_forward(x, padded_params, *, block_rows: int = 1024,
                            min_grid_steps: int = 2):
    """Fused MLP forward. x: (B, in_features) f32. padded_params from prepare_params()."""
    w1_p, b1_p, w2_p, b2_p = padded_params
    B, in_features = x.shape
    assert w1_p.shape[0] == in_features
    HID_P = w1_p.shape[1]
    out_features = w2_p.shape[1]

    TM, B_P, n_tiles = _choose_tiling(B, block_rows, min_grid_steps)

    x_in = x.astype(jnp.float32)
    if B_P > B:
        # Only row padding (natural lane width kept); padded rows are sliced off below.
        x_in = jnp.zeros((B_P, in_features), jnp.float32).at[:B, :].set(x_in)

    cost = pl.CostEstimate(
        flops=2 * B_P * (in_features * HID_P + HID_P * out_features),
        transcendentals=B_P * out_features,
        bytes_accessed=(B_P * in_features * 4          # x (f32, natural width)
                        + w1_p.size * 2 + w2_p.size * 2
                        + b1_p.size * 4 + b2_p.size * 4
                        + B_P * out_features * 4),     # output (f32, natural width)
    )

    # Explicit VMEM budget: double-buffered x/out tiles + resident weights
    # + f32 intermediates (h, bf16 copy, logits). Safe under v7x's 32 MiB scoped VMEM.
    vmem_bytes = (2 * TM * in_features * 4
                  + 2 * TM * out_features * 4
                  + w1_p.size * 2 + w2_p.size * 2 + b1_p.size * 4 + b2_p.size * 4
                  + 3 * TM * HID_P * 4)
    vmem_limit = int(min(max(2 * vmem_bytes, 4 << 20), 32 << 20))

    out_p = pl.pallas_call(
        mlp_kernel,
        out_shape=jax.ShapeDtypeStruct((B_P, out_features), jnp.float32),
        grid_spec=pltpu.PrefetchScalarGridSpec(
            num_scalar_prefetch=0,
            grid=(n_tiles,),
            in_specs=[
                # x: batch-tiled, natural feature width (block last dim == full dim).
                pl.BlockSpec((TM, in_features), lambda i: (i, 0)),
                # Weights/biases: index_map -> (0,0) keeps them VMEM-resident.
                pl.BlockSpec((in_features, HID_P), lambda i: (0, 0)),
                pl.BlockSpec((1, HID_P), lambda i: (0, 0)),
                pl.BlockSpec((HID_P, out_features), lambda i: (0, 0)),
                pl.BlockSpec((1, out_features), lambda i: (0, 0)),
            ],
            # Natural-width f32 output: ~32x smaller writeback than 128-padded.
            out_specs=pl.BlockSpec((TM, out_features), lambda i: (i, 0)),
        ),
        compiler_params=pltpu.CompilerParams(
            # Independent batch tiles -> shard across both TCs on v7x; neutral elsewhere.
            dimension_semantics=("parallel",),
            vmem_limit_bytes=vmem_limit,
        ),
        cost_estimate=cost,
    )(x_in, w1_p, b1_p, w2_p, b2_p)

    return out_p[:B, :] if B_P > B else out_p


def init_params(key, input_size, hidden_size, output_size):
    """Deterministic init mimicking torch.nn.Linear (uniform +- 1/sqrt(fan_in)).
    Weights stored as (in_features, out_features) for x @ W."""
    k1, k2, k3, k4 = jax.random.split(key, 4)
    bound1 = 1.0 / (input_size ** 0.5)
    bound2 = 1.0 / (hidden_size ** 0.5)
    w1 = jax.random.uniform(k1, (input_size, hidden_size), jnp.float32, -bound1, bound1)
    b1 = jax.random.uniform(k2, (1, hidden_size), jnp.float32, -bound1, bound1)
    w2 = jax.random.uniform(k3, (hidden_size, output_size), jnp.float32, -bound2, bound2)
    b2 = jax.random.uniform(k4, (1, output_size), jnp.float32, -bound2, bound2)
    return w1, b1, w2, b2


if __name__ == "__main__":
    # Small shapes consistent with the module: batch=8, input=16, hidden=32, output=4.
    batch, input_size, hidden_size, output_size = 8, 16, 32, 4

    key = jax.random.PRNGKey(0)
    k_x, k_p = jax.random.split(key)
    x = jax.random.normal(k_x, (batch, input_size), jnp.float32)
    w1, b1, w2, b2 = init_params(k_p, input_size, hidden_size, output_size)

    # Pad/cast weights ONCE (init-time), then run the fused kernel.
    padded = prepare_params(w1, b1, w2, b2)
    out = fraud_detection_forward(x, padded)
    out = jax.block_until_ready(out)

    # Pure-JAX f32 reference (same semantics as the PyTorch forward).
    ref = jax.nn.sigmoid(jnp.maximum(x @ w1 + b1, 0.0) @ w2 + b2)
    assert out.shape == (batch, output_size)
    # Tolerance accounts for bf16 matmul inputs (outputs are in [0,1]).
    assert jnp.allclose(out, ref, atol=2e-2, rtol=2e-2), (
        f"max abs err = {float(jnp.max(jnp.abs(out - ref)))}")

    print("KERNEL_OK")
</pallas_src>

<mosaic_0001>
module attributes {stable_mosaic.version = 11 : i64} {
  func.func @mlp_kernel(%arg0: i32, %arg1: memref<8x16xf32, #tpu.memory_space<vmem>>, %arg2: memref<16x128xbf16, #tpu.memory_space<vmem>>, %arg3: memref<1x128xf32, #tpu.memory_space<vmem>>, %arg4: memref<128x4xbf16, #tpu.memory_space<vmem>>, %arg5: memref<1x4xf32, #tpu.memory_space<vmem>>, %arg6: memref<8x4xf32, #tpu.memory_space<vmem>>) attributes {dimension_semantics = [#tpu.dimension_semantics<parallel>], iteration_bounds = array<i64: 1>, scalar_prefetch = 0 : i64, scratch_operands = 0 : i64, tpu.core_type = #tpu.core_type<tc>, window_params = [{transform_indices = @transform_0, window_bounds = array<i64: 8, 16>}, {pipeline_mode = #tpu.pipeline_mode<synchronous>, transform_indices = @transform_1, window_bounds = array<i64: 16, 128>}, {pipeline_mode = #tpu.pipeline_mode<synchronous>, transform_indices = @transform_2, window_bounds = array<i64: 1, 128>}, {pipeline_mode = #tpu.pipeline_mode<synchronous>, transform_indices = @transform_3, window_bounds = array<i64: 128, 4>}, {pipeline_mode = #tpu.pipeline_mode<synchronous>, transform_indices = @transform_4, window_bounds = array<i64: 1, 4>}, {transform_indices = @transform_5, window_bounds = array<i64: 8, 4>}]} {
    %c0 = arith.constant 0 : index
    %c0_0 = arith.constant 0 : index
    %0 = vector.load %arg1[%c0, %c0_0] : memref<8x16xf32, #tpu.memory_space<vmem>>, vector<8x16xf32>
    %1 = arith.truncf %0 : vector<8x16xf32> to vector<8x16xbf16>
    %c0_1 = arith.constant 0 : index
    %c0_2 = arith.constant 0 : index
    %2 = vector.load %arg2[%c0_1, %c0_2] : memref<16x128xbf16, #tpu.memory_space<vmem>>, vector<16x128xbf16>
    %c0_3 = arith.constant 0 : index
    %c0_4 = arith.constant 0 : index
    %3 = vector.load %arg4[%c0_3, %c0_4] : memref<128x4xbf16, #tpu.memory_space<vmem>>, vector<128x4xbf16>
    %cst = arith.constant dense<0.000000e+00> : vector<8x128xf32>
    %4 = tpu.matmul %1, %2, %cst {dimension_numbers = #tpu.dot_dimension_numbers<[1], [0], [0], [1], [0, 0, 1, 1], [], []>} : vector<8x16xbf16>, vector<16x128xbf16>, vector<8x128xf32> -> vector<8x128xf32>
    %c0_5 = arith.constant 0 : index
    %c0_6 = arith.constant 0 : index
    %5 = vector.load %arg3[%c0_5, %c0_6] : memref<1x128xf32, #tpu.memory_space<vmem>>, vector<1x128xf32>
    %6 = vector.broadcast %5 : vector<1x128xf32> to vector<8x128xf32>
    %7 = arith.addf %4, %6 : vector<8x128xf32>
    %cst_7 = arith.constant 0.000000e+00 : f32
    %8 = vector.broadcast %cst_7 : f32 to vector<8x128xf32>
    %9 = arith.maximumf %7, %8 : vector<8x128xf32>
    %10 = arith.truncf %9 : vector<8x128xf32> to vector<8x128xbf16>
    %cst_8 = arith.constant dense<0.000000e+00> : vector<8x4xf32>
    %11 = tpu.matmul %10, %3, %cst_8 {dimension_numbers = #tpu.dot_dimension_numbers<[1], [0], [0], [1], [0, 0, 1, 1], [], []>} : vector<8x128xbf16>, vector<128x4xbf16>, vector<8x4xf32> -> vector<8x4xf32>
    %c0_9 = arith.constant 0 : index
    %c0_10 = arith.constant 0 : index
    %12 = vector.load %arg5[%c0_9, %c0_10] : memref<1x4xf32, #tpu.memory_space<vmem>>, vector<1x4xf32>
    %13 = vector.broadcast %12 : vector<1x4xf32> to vector<8x4xf32>
    %14 = arith.addf %11, %13 : vector<8x4xf32>
    %cst_11 = arith.constant 0.000000e+00 : f32
    %15 = vector.broadcast %cst_11 : f32 to vector<8x4xf32>
    %16 = arith.subf %15, %14 : vector<8x4xf32>
    %17 = math.exp %16 : vector<8x4xf32>
    %cst_12 = arith.constant 1.000000e+00 : f32
    %18 = vector.broadcast %cst_12 : f32 to vector<8x4xf32>
    %19 = arith.addf %18, %17 : vector<8x4xf32>
    %cst_13 = arith.constant 1.000000e+00 : f32
    %20 = vector.broadcast %cst_13 : f32 to vector<8x4xf32>
    %21 = arith.divf %20, %19 : vector<8x4xf32>
    %c0_14 = arith.constant 0 : index
    %c0_15 = arith.constant 0 : index
    %22 = vector.load %arg6[%c0_14, %c0_15] : memref<8x4xf32, #tpu.memory_space<vmem>>, vector<8x4xf32>
    tpu.vector_store %arg6[%c0_14, %c0_15], %21 {strides = array<i32>} : memref<8x4xf32, #tpu.memory_space<vmem>>, vector<8x4xf32>,
    return
  }
  func.func @transform_0(%arg0: i32) -> (i32, i32) {
    %c0_i32 = arith.constant 0 : i32
    %c0_i32_0 = arith.constant 0 : i32
    return %arg0, %c0_i32 : i32, i32
  }
  func.func @transform_1(%arg0: i32) -> (i32, i32) {
    %c0_i32 = arith.constant 0 : i32
    %c0_i32_0 = arith.constant 0 : i32
    %c0_i32_1 = arith.constant 0 : i32
    return %c0_i32, %c0_i32_0 : i32, i32
  }
  func.func @transform_2(%arg0: i32) -> (i32, i32) {
    %c0_i32 = arith.constant 0 : i32
    %c0_i32_0 = arith.constant 0 : i32
    %c0_i32_1 = arith.constant 0 : i32
    return %c0_i32, %c0_i32_0 : i32, i32
  }
  func.func @transform_3(%arg0: i32) -> (i32, i32) {
    %c0_i32 = arith.constant 0 : i32
    %c0_i32_0 = arith.constant 0 : i32
    %c0_i32_1 = arith.constant 0 : i32
    return %c0_i32, %c0_i32_0 : i32, i32
  }
  func.func @transform_4(%arg0: i32) -> (i32, i32) {
    %c0_i32 = arith.constant 0 : i32
    %c0_i32_0 = arith.constant 0 : i32
    %c0_i32_1 = arith.constant 0 : i32
    return %c0_i32, %c0_i32_0 : i32, i32
  }
  func.func @transform_5(%arg0: i32) -> (i32, i32) {
    %c0_i32 = arith.constant 0 : i32
    %c0_i32_0 = arith.constant 0 : i32
    return %arg0, %c0_i32 : i32, i32
  }
}

</mosaic_0001>

<bundles_post_ra>
// kernel: tpu_custom_call.1
= control target key start
LH: loop header
LB: loop body
LE: loop exit
PB: predicated region body
PF: predicated region fallthrough
CT: control target
= control target key end

     0   :  { %v271_v0 = vmov 0.0   ;;  %vm272_vm0 = vmmov 0   ;;  %vm54_vm1 = vcmask 130048   ;;  %vm201_vm2 = vcmask 31744   ;;  %s342_s1 = inlined_call_operand.vmem [shape: bf16[16,128], index: 1, kind: input, shape index: {}]   ;;  %s343_s0 = inlined_call_operand.vmem [shape: f32[8,16], index: 0, kind: input, shape index: {}]   ;;  %s344_s3 = inlined_call_operand.vmem [shape: bf16[128,4], index: 3, kind: input, shape index: {}]   ;;  %s345_s2 = inlined_call_operand.vmem [shape: f32[1,128], index: 2, kind: input, shape index: {}]   ;;  %s346_s4 = inlined_call_operand.vmem [shape: f32[1,4], index: 4, kind: input, shape index: {}]   ;;  %s347_s5 = inlined_call_operand.vmem [shape: f32[8,4], index: 5, kind: output, shape index: {}]  }
   0x1   :  { %230 = vmatprep.subr.bf16.mxu0 %v271_v0  ;;  %v258_v1 = vld [vmem:[%s342_s1] sm:$0xff]   ;;  %232 = vmatprep.mubr.msk.bf16.mxu0 %vm272_vm0, %v271_v0  ;;  %v260_v5 = vld [vmem:[%s344_s3 + $0x8] sm:$0xff]   ;;  %v261_v6 = vld [vmem:[%s344_s3 + $0x10] sm:$0xff]  }
   0x2   :  { %v21_v2 = vld [vmem:[%s343_s0] sm:$0xff]  ;;  %236 = vmatprep.subr.bf16.mxu1 %v271_v0  ;;  %252 = vmatprep.mubr.msk.bf16.mxu1 %vm272_vm0, %v271_v0  ;;  %v262_v7 = vld [vmem:[%s344_s3 + $0x18] sm:$0xff]   ;;  %v264_v9 = vld [vmem:[%s344_s3 + $0x28] sm:$0xff]  }
   0x3   :  { %231 = vmatpush3.bf16.msra.mxu0 %v258_v1  ;;  %v22_v3 = vpack.c.bf16 %v21_v2, %v21_v2  ;;  %v259_v4 = vld [vmem:[%s344_s3] sm:$0xff]   ;;  %v265_v10 = vld [vmem:[%s344_s3 + $0x30] sm:$0xff]   ;;  %v266_v11 = vld [vmem:[%s344_s3 + $0x38] sm:$0xff]  }
   0x4   :  { %237 = vmatpush3.bf16.msra.mxu1 %v259_v4  ;;  %v263_v8 = vld [vmem:[%s344_s3 + $0x20] sm:$0xff]  }
   0x5   :  { %238 = vmatprep.subr.bf16.mxu1 %v271_v0  ;;  %v207_v12 = vld [vmem:[%s345_s2] ss:$0 sm:$0xff] }
   0x6   :  { %233 = vmatmul.mubr.msk.bf16.vlgmr.msra.gmra.mrb[0].mxu0 %vm54_vm1, %v22_v3  ;;  %v210_v20 = vld [vmem:[%s346_s4] ss:$0 sm:$0xff] }
   0x8   :  { %239 = vmatpush3.bf16.msra.mxu1 %v260_v5 }
   0x9   :  { %240 = vmatprep.subr.bf16.mxu1 %v271_v0 }
   0xc   :  { %241 = vmatpush3.bf16.msra.mxu1 %v261_v6 }
   0xd   :  { %242 = vmatprep.subr.bf16.mxu1 %v271_v0 }
  0x10   :  { %243 = vmatpush3.bf16.msra.mxu1 %v262_v7 }
  0x11   :  { %244 = vmatprep.subr.bf16.mxu1 %v271_v0 }
  0x14   :  { %245 = vmatpush3.bf16.msra.mxu1 %v263_v8 }
  0x15   :  { %246 = vmatprep.subr.bf16.mxu1 %v271_v0 }
  0x18   :  { %247 = vmatpush3.bf16.msra.mxu1 %v264_v9 }
  0x19   :  { %248 = vmatprep.subr.bf16.mxu1 %v271_v0 }
  0x1c   :  { %249 = vmatpush3.bf16.msra.mxu1 %v265_v10 }
  0x1d   :  { %250 = vmatprep.subr.bf16.mxu1 %v271_v0 }
  0x20   :  { %251 = vmatpush3.bf16.msra.mxu1 %v266_v11 }
  0xd9   :  { %v92_v13 = vpop.f32.mrb[0].mxu0 }
  0xda   :  { %v93_v14 = vadd.f32 %v207_v12, %v92_v13  ;;  %v234_v15 = vpop.f32.mrb[1].mxu0 }
  0xdb   :  { %v95_v16 = vpop.f32.mrb[2].mxu0 }
  0xdc   :  { %v98_v17 = vmax.f32 %v93_v14, 0.0  ;;  %v235_v18 = vpop.f32.mrb[3].mxu0 }
  0xde   :  { %v99_v19 = vpack.c.bf16 %v98_v17, %v98_v17 }
  0xe0   :  { %253 = vmatmul.mubr.bf16.vlgmr.msra.gmra.mrb[0].mxu1 %v99_v19 }
 0x1b3   :  { %v189_v21 = vpop.f32.mrb[0].mxu1 }
 0x1b4   :  { %v190_v22 = vadd.f32 %v210_v20, %v189_v21  ;;  %v254_v23 = vpop.f32.mrb[1].mxu1 }
 0x1b5   :  { %v192_v24 = vpop.f32.mrb[2].mxu1 }
 0x1b6   :  { %v195_v25 = vsub.f32 0.0, %v190_v22  ;;  %v255_v26 = vpop.f32.mrb[3].mxu1 }
 0x1b8   :  { %v196_v27 = vmul.f32 1.442695, %v195_v25 }
 0x1ba   :  { %267 = vpow2.f32 %v196_v27 }
 0x1c4   :  { %v268_v28 = vpop.eup %267 }
 0x1c5   :  { %v198_v29 = vadd.f32 1.0, %v268_v28 }
 0x1c7   :  { %269 = vrcp.f32 %v198_v29 }
 0x1d1   :  { %v270_v30 = vpop.eup %269 }
 0x1d2   :  { %202 = vst.msk [vmem:[%s347_s5] sm:$0xff] %vm201_vm2, %v270_v30 }

</bundles_post_ra>
